<compile_context>
chip_gen: v7x
topology: tpu7x:2x2x1
jax: 0.10.0
libtpu: 0.0.40
codegen_flags: <defaults>
</compile_context>

<pallas_src>
import functools

import jax
import jax.numpy as jnp
from jax import lax
from jax.experimental import pallas as pl
from jax.experimental.pallas import tpu as pltpu


def _round_up(x, m):
    return (x + m - 1) // m * m


def _icloss_kernel(f_ref, l_ref, qf_ref, ql_ref, out_ref,
                   m_sc, l_sc, t_sc, tp_sc, sp_sc, cp_sc,
                   *, tau, q_real, tq):
    qi = pl.program_id(1)
    nq = pl.num_programs(1)

    @pl.when(qi == 0)
    def _init():
        m_sc[...] = jnp.full_like(m_sc, -jnp.inf)   # running row max
        l_sc[...] = jnp.zeros_like(l_sc)            # running sum exp(adc - m)
        t_sc[...] = jnp.zeros_like(t_sc)            # running count(adc == m)
        tp_sc[...] = jnp.zeros_like(tp_sc)          # running count(match & adc == m)
        sp_sc[...] = jnp.zeros_like(sp_sc)          # running sum(match * adc)
        cp_sc[...] = jnp.zeros_like(cp_sc)          # running count(match)

    # Fold 1/tau into the (small) LHS: N*D scalar muls instead of N*Q.
    f = f_ref[...] * (1.0 / tau)                    # (TM, D)
    qf = qf_ref[...]                                # (TQ, D)

    # anchor_dot_contrast tile: contract over D directly (no transpose copy).
    adc = lax.dot_general(
        f, qf, dimension_numbers=(((1,), (1,)), ((), ())),
        preferred_element_type=jnp.float32)         # (TM, TQ) f32

    match = l_ref[...] == ql_ref[...]               # (TM, TQ) bool

    # Mask out padded queue columns (only the last Q tile can contain padding).
    if q_real % tq != 0:
        col = qi * tq + lax.broadcasted_iota(jnp.int32, adc.shape, 1)
        valid = col < q_real
        adc = jnp.where(valid, adc, -jnp.inf)
        match = jnp.logical_and(match, valid)
    match_f = match.astype(jnp.float32)

    # ---- online (streamed over Q tiles) per-row statistics ----
    m_old = m_sc[...]                               # (TM, 1)
    blk_max = jnp.max(adc, axis=1, keepdims=True)   # (TM, 1)
    m_new = jnp.maximum(m_old, blk_max)

    keep = (m_old == m_new).astype(jnp.float32)     # 1 if running max unchanged
    is_max = (adc == m_new).astype(jnp.float32)     # ties with current running max

    scale = jnp.exp(m_old - m_new)                  # rescale old exp-sum
    e = jnp.exp(adc - m_new)                        # padded cols -> exp(-inf) = 0
    l_sc[...] = l_sc[...] * scale + jnp.sum(e, axis=1, keepdims=True)
    t_sc[...] = t_sc[...] * keep + jnp.sum(is_max, axis=1, keepdims=True)
    tp_sc[...] = tp_sc[...] * keep + jnp.sum(match_f * is_max, axis=1, keepdims=True)
    sp_sc[...] += jnp.sum(jnp.where(match, adc, 0.0), axis=1, keepdims=True)
    cp_sc[...] += jnp.sum(match_f, axis=1, keepdims=True)
    m_sc[...] = m_new

    @pl.when(qi == nq - 1)
    def _finalize():
        m = m_sc[...]
        # torch: logits_mask zeroes every position where adc == row max (incl. ties)
        denom = l_sc[...] - t_sc[...]               # sum(exp(logits) * logits_mask)
        cnt_pos = cp_sc[...] - tp_sc[...]           # mask.sum(1)
        # sum(mask * logits): tied positives contribute exactly 0, so summing
        # over ALL matching columns is algebraically identical.
        sum_masked_logits = sp_sc[...] - cp_sc[...] * m
        out_ref[...] = sum_masked_logits / cnt_pos - jnp.log(denom)


@functools.partial(jax.jit, static_argnames=("tau", "block_m", "block_q"))
def icloss(features, labels, queue_features, queue_labels, tau=0.1,
           block_m=128, block_q=512):
    n, d = features.shape
    q, dq = queue_features.shape
    assert d == dq

    # bf16 operands feed the MXU directly (f32 accumulation); otherwise f32.
    if features.dtype != jnp.bfloat16:
        features = features.astype(jnp.float32)
    queue_features = queue_features.astype(features.dtype)

    tm = min(block_m, _round_up(n, 8))
    tq = min(block_q, _round_up(q, 128))
    n_pad = _round_up(n, tm)
    q_pad = _round_up(q, tq)
    d_pad = _round_up(d, 128)

    f = jnp.zeros((n_pad, d_pad), features.dtype).at[:n, :d].set(features)
    qf = jnp.zeros((q_pad, d_pad), queue_features.dtype).at[:q, :d].set(queue_features)
    lab = jnp.full((n_pad, 1), -1, jnp.int32).at[:n, 0].set(labels.astype(jnp.int32))
    qlab = jnp.full((1, q_pad), -2, jnp.int32).at[0, :q].set(queue_labels.astype(jnp.int32))

    grid = (n_pad // tm, q_pad // tq)

    mean_log_prob_pos = pl.pallas_call(
        functools.partial(_icloss_kernel, tau=float(tau), q_real=q, tq=tq),
        out_shape=jax.ShapeDtypeStruct((n_pad, 1), jnp.float32),
        grid_spec=pltpu.PrefetchScalarGridSpec(
            num_scalar_prefetch=0,
            grid=grid,
            in_specs=[
                pl.BlockSpec((tm, d_pad), lambda i, k: (i, 0)),   # features
                pl.BlockSpec((tm, 1), lambda i, k: (i, 0)),       # labels
                pl.BlockSpec((tq, d_pad), lambda i, k: (k, 0)),   # queue features
                pl.BlockSpec((1, tq), lambda i, k: (0, k)),       # queue labels
            ],
            out_specs=pl.BlockSpec((tm, 1), lambda i, k: (i, 0)),
            scratch_shapes=[pltpu.VMEM((tm, 1), jnp.float32) for _ in range(6)],
        ),
        compiler_params=pltpu.CompilerParams(
            dimension_semantics=("parallel", "arbitrary")),
    )(f, lab, qf, qlab)

    mlpp = mean_log_prob_pos[:n, 0]
    loss = -jnp.mean(mlpp)
    # torch: return 0.0 if the loss is NaN (e.g. a row with no positive pairs)
    return jnp.where(jnp.isnan(loss), jnp.float32(0.0), loss)


def _icloss_ref(features, labels, queue_features, queue_labels, tau=0.1):
    """Pure-JAX reference mirroring the PyTorch forward, for verification."""
    mask = (labels[:, None] == queue_labels[None, :]).astype(jnp.float32)
    adc = jnp.matmul(features, queue_features.T) / tau
    logits_max = jnp.max(adc, axis=1, keepdims=True)
    logits = adc - logits_max
    logits_mask = (logits != 0.0).astype(jnp.float32)
    mask = mask * logits_mask
    exp_logits = jnp.exp(logits) * logits_mask
    log_prob = logits - jnp.log(exp_logits.sum(1, keepdims=True))
    mean_log_prob_pos = (mask * log_prob).sum(1) / mask.sum(1)
    loss = -mean_log_prob_pos.mean()
    return jnp.where(jnp.isnan(loss), jnp.float32(0.0), loss)


if __name__ == "__main__":
    key = jax.random.PRNGKey(0)
    k_f, k_l, k_qf, k_ql = jax.random.split(key, 4)

    N, D, Q = 40, 80, 300       # anchors, feature dim, queue size (small demo)
    NUM_CLASSES = 5

    features = jax.random.normal(k_f, (N, D), dtype=jnp.float32)
    features = features / jnp.linalg.norm(features, axis=1, keepdims=True)
    queue_features = jax.random.normal(k_qf, (Q, D), dtype=jnp.float32)
    queue_features = queue_features / jnp.linalg.norm(queue_features, axis=1, keepdims=True)
    labels = jax.random.randint(k_l, (N,), 0, NUM_CLASSES, dtype=jnp.int32)
    queue_labels = jax.random.randint(k_ql, (Q,), 0, NUM_CLASSES, dtype=jnp.int32)

    ref = jax.block_until_ready(
        _icloss_ref(features, labels, queue_features, queue_labels, tau=0.1))

    # Small tiles: exercises N/Q/D padding + the multi-tile online reduction.
    loss_tiled = jax.block_until_ready(
        icloss(features, labels, queue_features, queue_labels, tau=0.1,
               block_m=16, block_q=128))
    assert jnp.allclose(loss_tiled, ref, rtol=5e-4, atol=5e-4), (loss_tiled, ref)

    # Default (production-style) tiles: single Q tile for this problem size.
    loss_default = jax.block_until_ready(
        icloss(features, labels, queue_features, queue_labels, tau=0.1))
    assert jnp.allclose(loss_default, ref, rtol=5e-4, atol=5e-4), (loss_default, ref)

    print("KERNEL_OK")
</pallas_src>

<mosaic_0001>
module attributes {stable_mosaic.version = 11 : i64} {
  func.func @_icloss_kernel(%arg0: i32, %arg1: i32, %arg2: memref<16x128xf32, #tpu.memory_space<vmem>>, %arg3: memref<16x1xi32, #tpu.memory_space<vmem>>, %arg4: memref<128x128xf32, #tpu.memory_space<vmem>>, %arg5: memref<1x128xi32, #tpu.memory_space<vmem>>, %arg6: memref<16x1xf32, #tpu.memory_space<vmem>>, %arg7: memref<16x1xf32, #tpu.memory_space<vmem>>, %arg8: memref<16x1xf32, #tpu.memory_space<vmem>>, %arg9: memref<16x1xf32, #tpu.memory_space<vmem>>, %arg10: memref<16x1xf32, #tpu.memory_space<vmem>>, %arg11: memref<16x1xf32, #tpu.memory_space<vmem>>, %arg12: memref<16x1xf32, #tpu.memory_space<vmem>>) attributes {dimension_semantics = [#tpu.dimension_semantics<parallel>, #tpu.dimension_semantics<arbitrary>], iteration_bounds = array<i64: 3, 3>, scalar_prefetch = 0 : i64, scratch_operands = 6 : i64, tpu.core_type = #tpu.core_type<tc>, window_params = [{transform_indices = @transform_0, window_bounds = array<i64: 16, 128>}, {transform_indices = @transform_1, window_bounds = array<i64: 16, 1>}, {transform_indices = @transform_2, window_bounds = array<i64: 128, 128>}, {transform_indices = @transform_3, window_bounds = array<i64: 1, 128>}, {transform_indices = @transform_4, window_bounds = array<i64: 16, 1>}]} {
    %c0_i32 = arith.constant 0 : i32
    %0 = arith.cmpi eq, %arg1, %c0_i32 : i32
    %1 = arith.extui %0 : i1 to i32
    %c0_i32_0 = arith.constant 0 : i32
    %2 = arith.cmpi ne, %1, %c0_i32_0 : i32
    scf.if %2 {
      %cst_42 = arith.constant 0xFF800000 : f32
      %75 = vector.broadcast %cst_42 : f32 to vector<16x1xf32>
      %c0_43 = arith.constant 0 : index
      %c0_44 = arith.constant 0 : index
      %76 = vector.load %arg7[%c0_43, %c0_44] : memref<16x1xf32, #tpu.memory_space<vmem>>, vector<16x1xf32>
      tpu.vector_store %arg7[%c0_43, %c0_44], %75 {strides = array<i32>} : memref<16x1xf32, #tpu.memory_space<vmem>>, vector<16x1xf32>,
      %cst_45 = arith.constant 0.000000e+00 : f32
      %77 = vector.broadcast %cst_45 : f32 to vector<16x1xf32>
      %c0_46 = arith.constant 0 : index
      %c0_47 = arith.constant 0 : index
      %78 = vector.load %arg8[%c0_46, %c0_47] : memref<16x1xf32, #tpu.memory_space<vmem>>, vector<16x1xf32>
      tpu.vector_store %arg8[%c0_46, %c0_47], %77 {strides = array<i32>} : memref<16x1xf32, #tpu.memory_space<vmem>>, vector<16x1xf32>,
      %cst_48 = arith.constant 0.000000e+00 : f32
      %79 = vector.broadcast %cst_48 : f32 to vector<16x1xf32>
      %c0_49 = arith.constant 0 : index
      %c0_50 = arith.constant 0 : index
      %80 = vector.load %arg9[%c0_49, %c0_50] : memref<16x1xf32, #tpu.memory_space<vmem>>, vector<16x1xf32>
      tpu.vector_store %arg9[%c0_49, %c0_50], %79 {strides = array<i32>} : memref<16x1xf32, #tpu.memory_space<vmem>>, vector<16x1xf32>,
      %cst_51 = arith.constant 0.000000e+00 : f32
      %81 = vector.broadcast %cst_51 : f32 to vector<16x1xf32>
      %c0_52 = arith.constant 0 : index
      %c0_53 = arith.constant 0 : index
      %82 = vector.load %arg10[%c0_52, %c0_53] : memref<16x1xf32, #tpu.memory_space<vmem>>, vector<16x1xf32>
      tpu.vector_store %arg10[%c0_52, %c0_53], %81 {strides = array<i32>} : memref<16x1xf32, #tpu.memory_space<vmem>>, vector<16x1xf32>,
      %cst_54 = arith.constant 0.000000e+00 : f32
      %83 = vector.broadcast %cst_54 : f32 to vector<16x1xf32>
      %c0_55 = arith.constant 0 : index
      %c0_56 = arith.constant 0 : index
      %84 = vector.load %arg11[%c0_55, %c0_56] : memref<16x1xf32, #tpu.memory_space<vmem>>, vector<16x1xf32>
      tpu.vector_store %arg11[%c0_55, %c0_56], %83 {strides = array<i32>} : memref<16x1xf32, #tpu.memory_space<vmem>>, vector<16x1xf32>,
      %cst_57 = arith.constant 0.000000e+00 : f32
      %85 = vector.broadcast %cst_57 : f32 to vector<16x1xf32>
      %c0_58 = arith.constant 0 : index
      %c0_59 = arith.constant 0 : index
      %86 = vector.load %arg12[%c0_58, %c0_59] : memref<16x1xf32, #tpu.memory_space<vmem>>, vector<16x1xf32>
      tpu.vector_store %arg12[%c0_58, %c0_59], %85 {strides = array<i32>} : memref<16x1xf32, #tpu.memory_space<vmem>>, vector<16x1xf32>,
    } else {
    }
    %c0 = arith.constant 0 : index
    %c0_1 = arith.constant 0 : index
    %3 = vector.load %arg2[%c0, %c0_1] : memref<16x128xf32, #tpu.memory_space<vmem>>, vector<16x128xf32>
    %cst = arith.constant 1.000000e+01 : f32
    %4 = vector.broadcast %cst : f32 to vector<16x128xf32>
    %5 = arith.mulf %3, %4 : vector<16x128xf32>
    %c0_2 = arith.constant 0 : index
    %c0_3 = arith.constant 0 : index
    %6 = vector.load %arg4[%c0_2, %c0_3] : memref<128x128xf32, #tpu.memory_space<vmem>>, vector<128x128xf32>
    %cst_4 = arith.constant dense<0.000000e+00> : vector<16x128xf32>
    %7 = tpu.matmul %5, %6, %cst_4 {dimension_numbers = #tpu.dot_dimension_numbers<[1], [1], [0], [0], [0, 0, 1, 0], [], []>} : vector<16x128xf32>, vector<128x128xf32>, vector<16x128xf32> -> vector<16x128xf32>
    %c0_5 = arith.constant 0 : index
    %c0_6 = arith.constant 0 : index
    %8 = vector.load %arg3[%c0_5, %c0_6] : memref<16x1xi32, #tpu.memory_space<vmem>>, vector<16x1xi32>
    %c0_7 = arith.constant 0 : index
    %c0_8 = arith.constant 0 : index
    %9 = vector.load %arg5[%c0_7, %c0_8] : memref<1x128xi32, #tpu.memory_space<vmem>>, vector<1x128xi32>
    %10 = vector.broadcast %8 : vector<16x1xi32> to vector<16x128xi32>
    %11 = vector.broadcast %9 : vector<1x128xi32> to vector<16x128xi32>
    %12 = arith.cmpi eq, %10, %11 : vector<16x128xi32>
    %c128_i32 = arith.constant 128 : i32
    %13 = arith.muli %arg1, %c128_i32 : i32
    %14 = tpu.iota {dimensions = array<i32: 1>} : vector<16x128xi32>
    %15 = vector.broadcast %13 : i32 to vector<16x128xi32>
    %16 = arith.addi %15, %14 : vector<16x128xi32>
    %c300_i32 = arith.constant 300 : i32
    %17 = vector.broadcast %c300_i32 : i32 to vector<16x128xi32>
    %18 = arith.cmpi slt, %16, %17 : vector<16x128xi32>
    %cst_9 = arith.constant 0xFF800000 : f32
    %19 = vector.broadcast %cst_9 : f32 to vector<16x128xf32>
    %20 = arith.select %18, %7, %19 : vector<16x128xi1>, vector<16x128xf32>
    %21 = arith.andi %12, %18 : vector<16x128xi1>
    %22 = arith.extui %21 : vector<16x128xi1> to vector<16x128xi32>
    %23 = arith.sitofp %22 : vector<16x128xi32> to vector<16x128xf32>
    %c0_10 = arith.constant 0 : index
    %c0_11 = arith.constant 0 : index
    %24 = vector.load %arg7[%c0_10, %c0_11] : memref<16x1xf32, #tpu.memory_space<vmem>>, vector<16x1xf32>
    %cst_12 = arith.constant dense<0xFF800000> : vector<16xf32>
    %25 = vector.multi_reduction <maximumf>, %20, %cst_12 [1] : vector<16x128xf32> to vector<16xf32>
    %26 = vector.shape_cast %25 : vector<16xf32> to vector<16x1xf32>
    %27 = arith.maximumf %24, %26 : vector<16x1xf32>
    %28 = arith.cmpf oeq, %24, %27 : vector<16x1xf32>
    %29 = arith.extui %28 : vector<16x1xi1> to vector<16x1xi32>
    %30 = arith.sitofp %29 : vector<16x1xi32> to vector<16x1xf32>
    %31 = vector.broadcast %27 : vector<16x1xf32> to vector<16x128xf32>
    %32 = arith.cmpf oeq, %20, %31 : vector<16x128xf32>
    %33 = arith.extui %32 : vector<16x128xi1> to vector<16x128xi32>
    %34 = arith.sitofp %33 : vector<16x128xi32> to vector<16x128xf32>
    %35 = arith.subf %24, %27 : vector<16x1xf32>
    %36 = math.exp %35 : vector<16x1xf32>
    %37 = vector.broadcast %27 : vector<16x1xf32> to vector<16x128xf32>
    %38 = arith.subf %20, %37 : vector<16x128xf32>
    %39 = math.exp %38 : vector<16x128xf32>
    %c0_13 = arith.constant 0 : index
    %c0_14 = arith.constant 0 : index
    %40 = vector.load %arg8[%c0_13, %c0_14] : memref<16x1xf32, #tpu.memory_space<vmem>>, vector<16x1xf32>
    %41 = arith.mulf %40, %36 : vector<16x1xf32>
    %cst_15 = arith.constant dense<0.000000e+00> : vector<16xf32>
    %42 = vector.multi_reduction <add>, %39, %cst_15 [1] : vector<16x128xf32> to vector<16xf32>
    %43 = vector.shape_cast %42 : vector<16xf32> to vector<16x1xf32>
    %44 = arith.addf %41, %43 : vector<16x1xf32>
    %c0_16 = arith.constant 0 : index
    %c0_17 = arith.constant 0 : index
    %45 = vector.load %arg8[%c0_16, %c0_17] : memref<16x1xf32, #tpu.memory_space<vmem>>, vector<16x1xf32>
    tpu.vector_store %arg8[%c0_16, %c0_17], %44 {strides = array<i32>} : memref<16x1xf32, #tpu.memory_space<vmem>>, vector<16x1xf32>,
    %c0_18 = arith.constant 0 : index
    %c0_19 = arith.constant 0 : index
    %46 = vector.load %arg9[%c0_18, %c0_19] : memref<16x1xf32, #tpu.memory_space<vmem>>, vector<16x1xf32>
    %47 = arith.mulf %46, %30 : vector<16x1xf32>
    %cst_20 = arith.constant dense<0.000000e+00> : vector<16xf32>
    %48 = vector.multi_reduction <add>, %34, %cst_20 [1] : vector<16x128xf32> to vector<16xf32>
    %49 = vector.shape_cast %48 : vector<16xf32> to vector<16x1xf32>
    %50 = arith.addf %47, %49 : vector<16x1xf32>
    %c0_21 = arith.constant 0 : index
    %c0_22 = arith.constant 0 : index
    %51 = vector.load %arg9[%c0_21, %c0_22] : memref<16x1xf32, #tpu.memory_space<vmem>>, vector<16x1xf32>
    tpu.vector_store %arg9[%c0_21, %c0_22], %50 {strides = array<i32>} : memref<16x1xf32, #tpu.memory_space<vmem>>, vector<16x1xf32>,
    %c0_23 = arith.constant 0 : index
    %c0_24 = arith.constant 0 : index
    %52 = vector.load %arg10[%c0_23, %c0_24] : memref<16x1xf32, #tpu.memory_space<vmem>>, vector<16x1xf32>
    %53 = arith.mulf %52, %30 : vector<16x1xf32>
    %54 = arith.mulf %23, %34 : vector<16x128xf32>
    %cst_25 = arith.constant dense<0.000000e+00> : vector<16xf32>
    %55 = vector.multi_reduction <add>, %54, %cst_25 [1] : vector<16x128xf32> to vector<16xf32>
    %56 = vector.shape_cast %55 : vector<16xf32> to vector<16x1xf32>
    %57 = arith.addf %53, %56 : vector<16x1xf32>
    %c0_26 = arith.constant 0 : index
    %c0_27 = arith.constant 0 : index
    %58 = vector.load %arg10[%c0_26, %c0_27] : memref<16x1xf32, #tpu.memory_space<vmem>>, vector<16x1xf32>
    tpu.vector_store %arg10[%c0_26, %c0_27], %57 {strides = array<i32>} : memref<16x1xf32, #tpu.memory_space<vmem>>, vector<16x1xf32>,
    %c0_28 = arith.constant 0 : index
    %c0_29 = arith.constant 0 : index
    %59 = vector.load %arg11[%c0_28, %c0_29] : memref<16x1xf32, #tpu.memory_space<vmem>>, vector<16x1xf32>
    %cst_30 = arith.constant 0.000000e+00 : f32
    %60 = vector.broadcast %cst_30 : f32 to vector<16x128xf32>
    %61 = arith.select %21, %20, %60 : vector<16x128xi1>, vector<16x128xf32>
    %cst_31 = arith.constant dense<0.000000e+00> : vector<16xf32>
    %62 = vector.multi_reduction <add>, %61, %cst_31 [1] : vector<16x128xf32> to vector<16xf32>
    %63 = vector.shape_cast %62 : vector<16xf32> to vector<16x1xf32>
    %64 = arith.addf %59, %63 : vector<16x1xf32>
    %c0_32 = arith.constant 0 : index
    %c0_33 = arith.constant 0 : index
    %65 = vector.load %arg11[%c0_32, %c0_33] : memref<16x1xf32, #tpu.memory_space<vmem>>, vector<16x1xf32>
    tpu.vector_store %arg11[%c0_32, %c0_33], %64 {strides = array<i32>} : memref<16x1xf32, #tpu.memory_space<vmem>>, vector<16x1xf32>,
    %c0_34 = arith.constant 0 : index
    %c0_35 = arith.constant 0 : index
    %66 = vector.load %arg12[%c0_34, %c0_35] : memref<16x1xf32, #tpu.memory_space<vmem>>, vector<16x1xf32>
    %cst_36 = arith.constant dense<0.000000e+00> : vector<16xf32>
    %67 = vector.multi_reduction <add>, %23, %cst_36 [1] : vector<16x128xf32> to vector<16xf32>
    %68 = vector.shape_cast %67 : vector<16xf32> to vector<16x1xf32>
    %69 = arith.addf %66, %68 : vector<16x1xf32>
    %c0_37 = arith.constant 0 : index
    %c0_38 = arith.constant 0 : index
    %70 = vector.load %arg12[%c0_37, %c0_38] : memref<16x1xf32, #tpu.memory_space<vmem>>, vector<16x1xf32>
    tpu.vector_store %arg12[%c0_37, %c0_38], %69 {strides = array<i32>} : memref<16x1xf32, #tpu.memory_space<vmem>>, vector<16x1xf32>,
    %c0_39 = arith.constant 0 : index
    %c0_40 = arith.constant 0 : index
    %71 = vector.load %arg7[%c0_39, %c0_40] : memref<16x1xf32, #tpu.memory_space<vmem>>, vector<16x1xf32>
    tpu.vector_store %arg7[%c0_39, %c0_40], %27 {strides = array<i32>} : memref<16x1xf32, #tpu.memory_space<vmem>>, vector<16x1xf32>,
    %c2_i32 = arith.constant 2 : i32
    %72 = arith.cmpi eq, %arg1, %c2_i32 : i32
    %73 = arith.extui %72 : i1 to i32
    %c0_i32_41 = arith.constant 0 : i32
    %74 = arith.cmpi ne, %73, %c0_i32_41 : i32
    scf.if %74 {
      %c0_42 = arith.constant 0 : index
      %c0_43 = arith.constant 0 : index
      %75 = vector.load %arg7[%c0_42, %c0_43] : memref<16x1xf32, #tpu.memory_space<vmem>>, vector<16x1xf32>
      %c0_44 = arith.constant 0 : index
      %c0_45 = arith.constant 0 : index
      %76 = vector.load %arg8[%c0_44, %c0_45] : memref<16x1xf32, #tpu.memory_space<vmem>>, vector<16x1xf32>
      %c0_46 = arith.constant 0 : index
      %c0_47 = arith.constant 0 : index
      %77 = vector.load %arg9[%c0_46, %c0_47] : memref<16x1xf32, #tpu.memory_space<vmem>>, vector<16x1xf32>
      %78 = arith.subf %76, %77 : vector<16x1xf32>
      %c0_48 = arith.constant 0 : index
      %c0_49 = arith.constant 0 : index
      %79 = vector.load %arg12[%c0_48, %c0_49] : memref<16x1xf32, #tpu.memory_space<vmem>>, vector<16x1xf32>
      %c0_50 = arith.constant 0 : index
      %c0_51 = arith.constant 0 : index
      %80 = vector.load %arg10[%c0_50, %c0_51] : memref<16x1xf32, #tpu.memory_space<vmem>>, vector<16x1xf32>
      %81 = arith.subf %79, %80 : vector<16x1xf32>
      %c0_52 = arith.constant 0 : index
      %c0_53 = arith.constant 0 : index
      %82 = vector.load %arg11[%c0_52, %c0_53] : memref<16x1xf32, #tpu.memory_space<vmem>>, vector<16x1xf32>
      %c0_54 = arith.constant 0 : index
      %c0_55 = arith.constant 0 : index
      %83 = vector.load %arg12[%c0_54, %c0_55] : memref<16x1xf32, #tpu.memory_space<vmem>>, vector<16x1xf32>
      %84 = arith.mulf %83, %75 : vector<16x1xf32>
      %85 = arith.subf %82, %84 : vector<16x1xf32>
      %86 = arith.divf %85, %81 : vector<16x1xf32>
      %87 = math.log %78 : vector<16x1xf32>
      %88 = arith.subf %86, %87 : vector<16x1xf32>
      %c0_56 = arith.constant 0 : index
      %c0_57 = arith.constant 0 : index
      %89 = vector.load %arg6[%c0_56, %c0_57] : memref<16x1xf32, #tpu.memory_space<vmem>>, vector<16x1xf32>
      tpu.vector_store %arg6[%c0_56, %c0_57], %88 {strides = array<i32>} : memref<16x1xf32, #tpu.memory_space<vmem>>, vector<16x1xf32>,
    } else {
    }
    return
  }
  func.func @transform_0(%arg0: i32, %arg1: i32) -> (i32, i32) {
    %c0_i32 = arith.constant 0 : i32
    %c0_i32_0 = arith.constant 0 : i32
    return %arg0, %c0_i32 : i32, i32
  }
  func.func @transform_1(%arg0: i32, %arg1: i32) -> (i32, i32) {
    %c0_i32 = arith.constant 0 : i32
    %c0_i32_0 = arith.constant 0 : i32
    return %arg0, %c0_i32 : i32, i32
  }
  func.func @transform_2(%arg0: i32, %arg1: i32) -> (i32, i32) {
    %c0_i32 = arith.constant 0 : i32
    %c0_i32_0 = arith.constant 0 : i32
    return %arg1, %c0_i32 : i32, i32
  }
  func.func @transform_3(%arg0: i32, %arg1: i32) -> (i32, i32) {
    %c0_i32 = arith.constant 0 : i32
    %c0_i32_0 = arith.constant 0 : i32
    return %c0_i32, %arg1 : i32, i32
  }
  func.func @transform_4(%arg0: i32, %arg1: i32) -> (i32, i32) {
    %c0_i32 = arith.constant 0 : i32
    %c0_i32_0 = arith.constant 0 : i32
    return %arg0, %c0_i32 : i32, i32
  }
}

</mosaic_0001>

<bundles_post_ra>
// kernel: icloss.1
= control target key start
LH: loop header
LB: loop body
LE: loop exit
PB: predicated region body
PF: predicated region fallthrough
CT: control target
= control target key end

     0   :  { %s895_s15 = smov 0   ;;  %s897_s16 = smov 0   ;;  %s1043_s0 = inlined_call_operand.vmem [shape: f32[48,128], index: 0, kind: input, shape index: {}]   ;;  %s1044_s1 = inlined_call_operand.vmem [shape: s32[48,1], index: 1, kind: input, shape index: {}]   ;;  %s1045_s2 = inlined_call_operand.vmem [shape: f32[384,128], index: 2, kind: input, shape index: {}]   ;;  %s1046_s3 = inlined_call_operand.vmem [shape: s32[1,384], index: 3, kind: input, shape index: {}]   ;;  %s1047_s4 = inlined_call_operand.vmem [shape: f32[48,1], index: 4, kind: output, shape index: {}]  }
   0x1   :  { %s899_s17 = smov 0   ;;  %s901_s18 = smov 0  }
   0x2   :  { %s903_s19 = smov 0  }
   0x3 LB: > { %s23_s20 = sadd.s32 1, %s856_s17  ;;  %s26_s21 = sadd.s32 1, %s860_s18  ;;  %s864_s19 = sphi %s903_s19, %s14_s19   ;;  %s860_s18 = sphi %s901_s18, %s1051_s18   ;;  %s856_s17 = sphi %s899_s17, %s1050_s17   ;;  %s852_s16 = sphi %s897_s16, %s1049_s16   ;;  %s848_s15 = sphi %s895_s15, %s1048_s15  }
   0x4   : > { %p24_p0 = scmp.ge.s32.totalorder %s23_s20, 3  ;;  %p658_p1 = scmp.ge.s32.totalorder %s864_s19, 1 }
   0x5   : > { %p205_p2 = scmp.lt.s32.totalorder %s864_s19, 10 }
   0x6   : > { %s1053_s20 = smov (%p24_p0, %s23_s20), 0  ;;  %s1055_s21 = smov (!%p24_p0, %s26_s21), %s860_s18 }
   0x7   : > { %p206_p3 = pnand %p658_p1, %p205_p2  ;;  %p28_p4 = scmp.ge.s32.totalorder %s1055_s21, 3 }
   0x8   : > { %s659_s22 = sshll.u32 (!%p206_p3), %s852_s16, 1  ;;  %s663_s23 = sshll.u32 (!%p206_p3), %s848_s15, 4 }
   0x9   : > { %s1057_s21 = smov (%p28_p4, %s1055_s21), 0  ;;  %209 = sbr.rel (%p206_p3) target bundleno = 789 (0x315), region = 36 }
   0xa   : > { %p245_p5 = scmp.lt.s32.totalorder (!%p206_p3), %s659_s22, 5  ;;  %p257_p6 = scmp.lt.s32.totalorder (!%p206_p3), %s663_s23, 47 }
   0xb   : > { %p262_p7 = scmp.lt.s32.totalorder (!%p206_p3), %s848_s15, 2  ;;  %p667_p8 = scmp.ne.s32.totalorder (!%p206_p3), %s848_s15, 0 }
  0x10   : > { %s1059_s22 = smov (!%p245_p5, %s659_s22), 5  ;;  %s1061_s23 = smov (!%p257_p6, %s663_s23), 47 }
  0x11   : > { %s660_s24 = sshll.u32 %s1059_s22, 3  ;;  %s664_s5 = sshll.u32 %s1061_s23, 3  ;;  %vm275_vm0 = vcmask (!%p667_p8), 7168   ;;  %v866_v0 = vmov (!%p667_p8), -inf   ;;  %v867_v1 = vmov (!%p667_p8), 0.0  }
  0x12   : > { %s932_s27 = scalar_lea.vmem %s1043_s0, %s660_s24  ;;  %s937_s30 = scalar_lea.vmem %s1044_s1, %s660_s24  ;;  %276 = vst.msk [vmem:[#allocation2] sm:$0xff] (!%p667_p8), %vm275_vm0, %v866_v0  ;;  %277 = vst.msk [vmem:[#allocation2 + $0x8] sm:$0xff] (!%p667_p8), %vm275_vm0, %v866_v0 }
  0x13   : > { %s942_s8 = scalar_lea.vmem %s1047_s4, %s660_s24  ;;  %s947_s11 = scalar_lea.vmem %s1045_s2, %s664_s5  ;;  %278 = vst.msk [vmem:[#allocation3] sm:$0xff] (!%p667_p8), %vm275_vm0, %v867_v1  ;;  %279 = vst.msk [vmem:[#allocation3 + $0x8] sm:$0xff] (!%p667_p8), %vm275_vm0, %v867_v1 }
  0x14   : > { %s950_s12 = scalar_select %p262_p7, %s848_s15, 2 }
  0x15   : > { %274 = sbr.rel (%p667_p8) target bundleno = 28 (0x1c), region = 40  ;;  %280 = vst.msk [vmem:[#allocation4] sm:$0xff] (!%p667_p8), %vm275_vm0, %v867_v1  ;;  %281 = vst.msk [vmem:[#allocation4 + $0x8] sm:$0xff] (!%p667_p8), %vm275_vm0, %v867_v1 }
  0x16   : > { %s264_s16 = scalar_lea.vmem %s1046_s3, %s950_s12  ;;  %282 = vst.msk [vmem:[#allocation5] sm:$0xff] (!%p667_p8), %vm275_vm0, %v867_v1  ;;  %283 = vst.msk [vmem:[#allocation5 + $0x8] sm:$0xff] (!%p667_p8), %vm275_vm0, %v867_v1 }
  0x17   : > { %284 = vst.msk [vmem:[#allocation6] sm:$0xff] (!%p667_p8), %vm275_vm0, %v867_v1  ;;  %285 = vst.msk [vmem:[#allocation6 + $0x8] sm:$0xff] (!%p667_p8), %vm275_vm0, %v867_v1 }
  0x18   : > { %286 = vst.msk [vmem:[#allocation7] sm:$0xff] (!%p667_p8), %vm275_vm0, %v867_v1  ;;  %287 = vst.msk [vmem:[#allocation7 + $0x8] sm:$0xff] (!%p667_p8), %vm275_vm0, %v867_v1 }
  0x1c PF: > { %v292_v2 = vld [vmem:[%s947_s11] sm:$0xff]  ;;  %v293_v3 = vld [vmem:[%s947_s11 + $0x8] sm:$0xff]  ;;  %v294_v4 = vld [vmem:[%s947_s11 + $0x10] sm:$0xff]  ;;  %v868_v30 = vmov 0   ;;  %v399_v31 = vlaneseq  ;;  %s669_s22 = sshll.u32 %s848_s15, 7  ;;  %vm464_vm2 = vcmask 7168  }
  0x1d   : > { %v732_v5 = vpack.c.bf16 %v293_v3, %v292_v2  ;;  %v295_v6 = vld [vmem:[%s947_s11 + $0x18] sm:$0xff]  ;;  %v288_v8 = vld [vmem:[%s932_s27] sm:$0xff]  ;;  %v297_v10 = vld [vmem:[%s947_s11 + $0x28] sm:$0xff]  ;;  %809 = vset.pattern.permute.xlu0 %v868_v30  ;;  %808 = vset.pattern.permute.xlu1 %v868_v30  ;;  %v401_v33 = vstv %s669_s22  ;;  %v869_v52 = vmov 0.0   ;;  %p676_p9 = scmp.ne.s32.totalorder %s848_s15, 2 }
  0x1e   : > { %v736_v7 = vpack.c.bf16 %v295_v6, %v294_v4  ;;  %v296_v9 = vld [vmem:[%s947_s11 + $0x20] sm:$0xff]  ;;  %v290_v11 = vmul.f32 10.0, %v288_v8  ;;  %v298_v13 = vld [vmem:[%s947_s11 + $0x30] sm:$0xff]  ;;  %v299_v14 = vld [vmem:[%s947_s11 + $0x38] sm:$0xff]  ;;  %v400_v32 = vand.u32 127, %v399_v31 }
  0x1f   : > { %733 = vmatprep.subr.bf16.mxu0 %v732_v5  ;;  %v740_v12 = vpack.c.bf16 %v297_v10, %v296_v9  ;;  %v744_v15 = vpack.c.bf16 %v299_v14, %v298_v13  ;;  %v300_v16 = vld [vmem:[%s947_s11 + $0x40] sm:$0xff]  ;;  %v301_v17 = vld [vmem:[%s947_s11 + $0x48] sm:$0xff]  ;;  %v302_v19 = vld [vmem:[%s947_s11 + $0x50] sm:$0xff] }
  0x20   : > { %735 = vmatpush3.bf16.xpose.msra.mxu0 %v732_v5  ;;  %729 = vmatprep.mubr.f32.mxu0 %v290_v11  ;;  %v748_v18 = vpack.c.bf16 %v301_v17, %v300_v16  ;;  %v303_v20 = vld [vmem:[%s947_s11 + $0x58] sm:$0xff]  ;;  %v304_v22 = vld [vmem:[%s947_s11 + $0x60] sm:$0xff]  ;;  %v305_v23 = vld [vmem:[%s947_s11 + $0x68] sm:$0xff]  ;;  %v402_v34 = vadd.s32 %v401_v33, %v400_v32 }
  0x21   : > { %737 = vmatprep.subr.bf16.mxu0 %v736_v7  ;;  %v752_v21 = vpack.c.bf16 %v303_v20, %v302_v19  ;;  %v756_v24 = vpack.c.bf16 %v305_v23, %v304_v22  ;;  %v306_v25 = vld [vmem:[%s947_s11 + $0x70] sm:$0xff]  ;;  %v307_v26 = vld [vmem:[%s947_s11 + $0x78] sm:$0xff]  ;;  %v289_v28 = vld [vmem:[%s932_s27 + $0x8] sm:$0xff] }
  0x22   : > { %v760_v27 = vpack.c.bf16 %v307_v26, %v306_v25  ;;  %v291_v29 = vmul.f32 10.0, %v289_v28  ;;  %vm403_vm1 = vcmp.lt.s32.totalorder %v402_v34, 300  ;;  %v383_v39 = vld [vmem:[%s937_s30] sm:$0xff]  ;;  %v984_v43 = vld [vmem:[#allocation2 + $0x8] sm:$0xff]  ;;  %v505_v23 = vld [vmem:[#allocation7] sm:$0xff] }
  0x23   : > { %v979_v40 = vld [vmem:[#allocation2] sm:$0xff]  ;;  %v384_v48 = vld [vmem:[%s937_s30 + $0x8] sm:$0xff]  ;;  %v480_v25 = vld [vmem:[#allocation5 + $0x8] sm:$0xff] }
  0x24   : > { %v668_v50 = vld [vmem:[%s264_s16] ss:$0 sm:$0xff]  ;;  %v468_v9 = vld [vmem:[#allocation4 + $0x8] sm:$0xff]  ;;  %v455_v34 = vld [vmem:[#allocation3 + $0x8] sm:$0xff] }
  0x25   : > { %v467_v6 = vld [vmem:[#allocation4] sm:$0xff]  ;;  %v494_v19 = vld [vmem:[#allocation6 + $0x8] sm:$0xff] }
  0x28   : > { %739 = vmatpush3.bf16.xpose.msra.mxu0 %v736_v7 }
  0x29   : > { %741 = vmatprep.subr.bf16.mxu0 %v740_v12 }
  0x30   : > { %743 = vmatpush3.bf16.xpose.msra.mxu0 %v740_v12 }
  0x31   : > { %745 = vmatprep.subr.bf16.mxu0 %v744_v15 }
  0x38   : > { %747 = vmatpush3.bf16.xpose.msra.mxu0 %v744_v15  ;;  %v493_v15 = vld [vmem:[#allocation6] sm:$0xff] }
  0x39   : > { %749 = vmatprep.subr.bf16.mxu0 %v748_v18 }
  0x40   : > { %751 = vmatpush3.bf16.xpose.msra.mxu0 %v748_v18 }
  0x41   : > { %753 = vmatprep.subr.bf16.mxu0 %v752_v21 }
  0x48   : > { %755 = vmatpush3.bf16.xpose.msra.mxu0 %v752_v21 }
  0x49   : > { %757 = vmatprep.subr.bf16.mxu0 %v756_v24 }
  0x50   : > { %759 = vmatpush3.bf16.xpose.msra.mxu0 %v756_v24 }
  0x51   : > { %761 = vmatprep.subr.bf16.mxu0 %v760_v27 }
  0x58   : > { %763 = vmatpush3.bf16.xpose.msra.mxu0 %v760_v27 }
  0x5f   : > { %730 = vmatmul.mubr.f32.vlgmr.msra.gmra.mrb[0].mxu0 %v291_v29  ;;  %v479_v29 = vld [vmem:[#allocation5] sm:$0xff] }
 0x132   : > { %v731_v35 = vpop.f32.mrb[0].mxu0 }
 0x133   : > { %v374_v36 = vpop.f32.mrb[1].mxu0  ;;  %v405_v38 = vsel %vm403_vm1, %v731_v35, -inf }
 0x134   : > { %v404_v37 = vsel %vm403_vm1, %v374_v36, -inf }
 0x135   : > { %414 = vmax.xlane.f32.xlu0 %v404_v37 }
 0x139   : > { %416 = vmax.xlane.f32.xlu0 %v405_v38 }
 0x14f   : > { %387 = vperm.xlu0 %809, %v383_v39   ;;  %v454_v39 = vld [vmem:[#allocation3] sm:$0xff] }
 0x1c2   : > { %v415_v41 = vpop.xlane.xlu0 %414 }
 0x1c3   : > { %v982_v42 = vmax.f32 %v979_v40, %v415_v41 }
 0x1c5   : > { %v442_v44 = vsub.f32 %v979_v40, %v982_v42  ;;  %515 = vst.msk [vmem:[#allocation2] sm:$0xff] %vm464_vm2, %v982_v42  ;;  %428 = vperm.xlu1 %808, %v982_v42   ;;  %vm420_vm3 = vcmp.eq.f32.partialorder %v979_v40, %v982_v42 }
 0x1c6   : > { %v417_v45 = vpop.xlane.xlu0 %416  ;;  %v672_v5 = vsel %vm420_vm3, 1.0, %v869_v52 }
 0x1c7   : > { %v419_v46 = vmax.f32 %v984_v43, %v417_v45  ;;  %v469_v7 = vmul.f32 %v672_v5, %v467_v6  ;;  %v444_v22 = vmul.f32 1.442695, %v442_v44  ;;  %v481_v31 = vmul.f32 %v672_v5, %v479_v29  ;;  %v506_v44 = vld [vmem:[#allocation7 + $0x8] sm:$0xff] }
 0x1c9   : > { %v443_v47 = vsub.f32 %v984_v43, %v419_v46  ;;  %516 = vst.msk [vmem:[#allocation2 + $0x8] sm:$0xff] %vm464_vm2, %v419_v46  ;;  %433 = vperm.xlu1 %808, %v419_v46   ;;  %vm421_vm4 = vcmp.eq.f32.partialorder %v984_v43, %v419_v46 }
 0x1ca   : > { %v673_v10 = vsel %vm421_vm4, 1.0, %v869_v52 }
 0x1cb   : > { %v470_v12 = vmul.f32 %v673_v10, %v468_v9  ;;  %v446_v18 = vmul.f32 1.442695, %v443_v47  ;;  %v482_v27 = vmul.f32 %v673_v10, %v480_v25 }
 0x1cd   : > { %390 = vperm.xlu1 %808, %v384_v48  }
 0x1ce   : > { %v388_v51 = vpop.permute.xlu0 %387 }
 0x1cf   : > { %vm396_vm6 = vcmp.eq.s32.totalorder %v388_v51, %v668_v50 }
 0x1d0   : > { %vm406_vm8 = vmand %vm396_vm6, %vm403_vm1 }
 0x1d1   : > { %v495_v57 = vsel %vm406_vm8, %v404_v37, 0.0  ;;  %v670_v62 = vsel %vm406_vm8, 1.0, %v869_v52 }
 0x244   : > { %v429_v49 = vpop.permute.xlu1 %428 }
 0x245   : > { %vm436_vm5 = vcmp.eq.f32.partialorder %v404_v37, %v429_v49  ;;  %v448_v60 = vsub.f32 %v404_v37, %v429_v49 }
 0x246   : > { %v674_v53 = vsel %vm436_vm5, 1.0, %v869_v52 }
 0x247   : > { %471 = vadd.xlane.f32.xlu0 %v674_v53  ;;  %v450_v0 = vmul.f32 1.442695, %v448_v60  ;;  %v483_v2 = vmul.f32 %v674_v53, %v670_v62  ;;  %v522_v60 = vld [vmem:[#allocation2 + $0x8] sm:$0xff] (!%p676_p9) }
 0x248   : > { %v434_v54 = vpop.permute.xlu1 %433 }
 0x249   : > { %vm437_vm7 = vcmp.eq.f32.partialorder %v405_v38, %v434_v54  ;;  %v449_v58 = vsub.f32 %v405_v38, %v434_v54 }
 0x24a   : > { %v675_v55 = vsel %vm437_vm7, 1.0, %v869_v52 }
 0x24b   : > { %473 = vadd.xlane.f32.xlu1 %v675_v55  ;;  %v452_v61 = vmul.f32 1.442695, %v449_v58  ;;  %v521_v58 = vld [vmem:[#allocation2] sm:$0xff] (!%p676_p9) }
 0x24c   : > { %v391_v56 = vpop.permute.xlu1 %390 }
 0x24d   : > { %vm397_vm9 = vcmp.eq.s32.totalorder %v391_v56, %v668_v50  ;;  %810 = vpow2.f32 %v452_v61 }
 0x24e   : > { %vm407_vm10 = vmand %vm397_vm9, %vm403_vm1  ;;  %812 = vpow2.f32 %v450_v0 }
 0x24f   : > { %497 = vadd.xlane.f32.xlu1 %v495_v57  ;;  %v496_v59 = vsel %vm407_vm10, %v405_v38, 0.0  ;;  %v671_v63 = vsel %vm407_vm10, 1.0, %v869_v52  ;;  %814 = vpow2.f32 %v446_v18 }
 0x250   : > { %v484_v1 = vmul.f32 %v675_v55, %v671_v63  ;;  %816 = vpow2.f32 %v444_v22 }
 0x253   : > { %499 = vadd.xlane.f32.xlu1 %v496_v59 }
 0x257   : > { %507 = vadd.xlane.f32.xlu1 %v670_v62  ;;  %v811_v3 = vpop.eup %810 }
 0x258   : > { %v813_v4 = vpop.eup %812 }
 0x259   : > { %v815_v32 = vpop.eup %814 }
 0x25a   : > { %v457_v36 = vmul.f32 %v815_v32, %v455_v34  ;;  %v817_v37 = vpop.eup %816 }
 0x25b   : > { %487 = vadd.xlane.f32.xlu1 %v484_v1  ;;  %v456_v41 = vmul.f32 %v817_v37, %v454_v39 }
 0x25f   : > { %485 = vadd.xlane.f32.xlu1 %v483_v2 }
 0x263   : > { %460 = vadd.xlane.f32.xlu1 %v811_v3 }
 0x267   : > { %458 = vadd.xlane.f32.xlu1 %v813_v4 }
 0x26b   : > { %509 = vadd.xlane.f32.xlu1 %v671_v63 }
 0x2d4   : > { %v472_v8 = vpop.xlane.xlu0 %471 }
 0x2d5   : > { %v475_v11 = vadd.f32 %v472_v8, %v469_v7 }
 0x2d7   : > { %477 = vst.msk [vmem:[#allocation4] sm:$0xff] %vm464_vm2, %v475_v11 }
 0x2d8   : > { %v474_v13 = vpop.xlane.xlu1 %473 }
 0x2d9   : > { %v476_v14 = vadd.f32 %v474_v13, %v470_v12 }
 0x2db   : > { %478 = vst.msk [vmem:[#allocation4 + $0x8] sm:$0xff] %vm464_vm2, %v476_v14 }
 0x2dc   : > { %v498_v16 = vpop.xlane.xlu1 %497 }
 0x2dd   : > { %v501_v17 = vadd.f32 %v498_v16, %v493_v15 }
 0x2de   : > { %v525_v48 = vld [vmem:[#allocation4] sm:$0xff] (!%p676_p9) }
 0x2df   : > { %503 = vst.msk [vmem:[#allocation6] sm:$0xff] %vm464_vm2, %v501_v17 }
 0x2e0   : > { %v500_v20 = vpop.xlane.xlu1 %499 }
 0x2e1   : > { %v502_v21 = vadd.f32 %v500_v20, %v494_v19 }
 0x2e2   : > { %v526_v54 = vld [vmem:[#allocation4 + $0x8] sm:$0xff] (!%p676_p9) }
 0x2e3   : > { %504 = vst.msk [vmem:[#allocation6 + $0x8] sm:$0xff] %vm464_vm2, %v502_v21 }
 0x2e4   : > { %v508_v24 = vpop.xlane.xlu1 %507 }
 0x2e5   : > { %v511_v26 = vadd.f32 %v508_v24, %v505_v23 }
 0x2e6   : > { %v535_v62 = vld [vmem:[#allocation6] sm:$0xff] (!%p676_p9) }
 0x2e7   : > { %513 = vst.msk [vmem:[#allocation7] sm:$0xff] %vm464_vm2, %v511_v26 }
 0x2e8   : > { %v488_v28 = vpop.xlane.xlu1 %487 }
 0x2e9   : > { %v490_v30 = vadd.f32 %v488_v28, %v482_v27 }
 0x2ea   : > { %v536_v0 = vld [vmem:[#allocation6 + $0x8] sm:$0xff] (!%p676_p9) }
 0x2eb   : > { %492 = vst.msk [vmem:[#allocation5 + $0x8] sm:$0xff] %vm464_vm2, %v490_v30 }
 0x2ec   : > { %v486_v33 = vpop.xlane.xlu1 %485 }
 0x2ed   : > { %v489_v35 = vadd.f32 %v486_v33, %v481_v31 }
 0x2ee   : > { %v529_v50 = vld [vmem:[#allocation7] sm:$0xff] (!%p676_p9) }
 0x2ef   : > { %491 = vst.msk [vmem:[#allocation5] sm:$0xff] %vm464_vm2, %v489_v35  ;;  %v537_v61 = vmul.f32 (!%p676_p9), %v529_v50, %v521_v58 }
 0x2f0   : > { %v461_v38 = vpop.xlane.xlu1 %460 }
 0x2f1   : > { %v463_v40 = vadd.f32 %v461_v38, %v457_v36  ;;  %v539_v1 = vsub.f32 (!%p676_p9), %v535_v62, %v537_v61 }
 0x2f2   : > { %v532_v57 = vld [vmem:[#allocation5 + $0x8] sm:$0xff] (!%p676_p9) }
 0x2f3   : > { %466 = vst.msk [vmem:[#allocation3 + $0x8] sm:$0xff] %vm464_vm2, %v463_v40 }
 0x2f4   : > { %v459_v42 = vpop.xlane.xlu1 %458 }
 0x2f5   : > { %v462_v43 = vadd.f32 %v459_v42, %v456_v41  ;;  %520 = sbr.rel (%p676_p9) target bundleno = 789 (0x315), region = 44 }
 0x2f6   : > { %v531_v51 = vld [vmem:[#allocation5] sm:$0xff] (!%p676_p9) }
 0x2f7   : > { %465 = vst.msk [vmem:[#allocation3] sm:$0xff] %vm464_vm2, %v462_v43  ;;  %v533_v52 = vsub.f32 (!%p676_p9), %v529_v50, %v531_v51 }
 0x2f8   : > { %v510_v45 = vpop.xlane.xlu1 %509 }
 0x2f9   : > { %v512_v46 = vadd.f32 %v510_v45, %v506_v44 }
 0x2fa   : > { %v524_v53 = vld [vmem:[#allocation3 + $0x8] sm:$0xff] (!%p676_p9) }
 0x2fb   : > { %514 = vst.msk [vmem:[#allocation7 + $0x8] sm:$0xff] %vm464_vm2, %v512_v46  ;;  %v528_v55 = vsub.f32 (!%p676_p9), %v524_v53, %v526_v54 }
 0x2fe   : > { %v523_v47 = vld [vmem:[#allocation3] sm:$0xff] }
 0x2ff   : > { %v527_v49 = vsub.f32 %v523_v47, %v525_v48 }
 0x301   : > { %818 = vlog2.f32 %v527_v49 }
 0x302   : > { %v530_v56 = vld [vmem:[#allocation7 + $0x8] sm:$0xff]  ;;  %820 = vrcp.f32 %v533_v52 }
 0x303   : > { %v534_v59 = vsub.f32 %v530_v56, %v532_v57  ;;  %822 = vlog2.f32 %v528_v55  ;;  %v538_v63 = vmul.f32 %v530_v56, %v522_v60 }
 0x305   : > { %824 = vrcp.f32 %v534_v59  ;;  %v540_v3 = vsub.f32 %v536_v0, %v538_v63 }
 0x30b   : > { %v819_v2 = vpop.eup %818 }
 0x30c   : > { %v821_v4 = vpop.eup %820  ;;  %v546_v5 = vmul.f32 0.6931472, %v819_v2 }
 0x30d   : > { %v823_v6 = vpop.eup %822  ;;  %v542_v7 = vmul.f32 %v821_v4, %v539_v1 }
 0x30e   : > { %v548_v9 = vmul.f32 0.6931472, %v823_v6 }
 0x30f   : > { %v825_v8 = vpop.eup %824  ;;  %v549_v10 = vsub.f32 %v542_v7, %v546_v5 }
 0x310   : > { %v544_v11 = vmul.f32 %v825_v8, %v540_v3 }
 0x311   : > { %551 = vst.msk [vmem:[%s942_s8] sm:$0xff] %vm464_vm2, %v549_v10 }
 0x312   : > { %v550_v12 = vsub.f32 %v544_v11, %v548_v9 }
 0x314   : > { %552 = vst.msk [vmem:[%s942_s8 + $0x8] sm:$0xff] %vm464_vm2, %v550_v12 }
 0x315 PF: > { %s14_s19 = sadd.s32 1, %s864_s19   ;;  %s1048_s15 = smov %s856_s17 }
 0x316   : > { %p11_p10 = scmp.ge.s32.totalorder %s14_s19, 11   ;;  %s1049_s16 = smov %s860_s18 }
 0x317   : > { %s1050_s17 = smov %s1053_s20  ;;  %s1051_s18 = smov %s1057_s21 }
 0x318   :  { %13 = sbr.rel (!%p11_p10) target bundleno = 3 (0x3), region = 83 }

</bundles_post_ra>
